<compile_context>
chip_gen: v7x
topology: tpu7x:2x2x1
jax: 0.10.0
libtpu: 0.0.40
codegen_flags: <defaults>
</compile_context>

<pallas_src>
import functools
import math

import jax
import jax.numpy as jnp
from jax import lax
from jax.experimental import pallas as pl
from jax.experimental.pallas import tpu as pltpu  # noqa: F401  (TPU backend)


def _mha_kernel(q_ref, h_ref, mask_ref, wq_ref, wk_ref, wv_ref, wo_ref,
                out_ref, *, n_heads, key_dim, val_dim):
    q = q_ref[...]                    # (n_query, input_dim)
    hh = h_ref[...]                   # (graph_size, input_dim)
    m = mask_ref[...]                 # (n_query, graph_size), {0,1} f32

    # Fused all-head projections: one MXU matmul each, contraction = input_dim.
    # norm_factor is already folded into wq (done once at trace time).
    Q = jnp.dot(q, wq_ref[...], preferred_element_type=jnp.float32)    # (nq, H*kd)
    K = jnp.dot(hh, wk_ref[...], preferred_element_type=jnp.float32)   # (gs, H*kd)
    V = jnp.dot(hh, wv_ref[...], preferred_element_type=jnp.float32)   # (gs, H*vd)

    head_outs = []
    for hd in range(n_heads):         # tiny static unroll (H = 4)
        qh = Q[:, hd * key_dim:(hd + 1) * key_dim]   # (nq, kd)
        kh = K[:, hd * key_dim:(hd + 1) * key_dim]   # (gs, kd)
        vh = V[:, hd * val_dim:(hd + 1) * val_dim]   # (gs, vd)

        # Contract last dims directly -- no explicit K transpose.
        compat = lax.dot_general(qh, kh, (((1,), (1,)), ((), ())),
                                 preferred_element_type=jnp.float32)   # (nq, gs)

        # Reference mask semantics: multiply, then send exact zeros to -inf.
        compat = compat * m
        compat = jnp.where(compat == 0.0, jnp.float32(-jnp.inf), compat)

        # Softmax over graph_size (denominator on the EUP via approx reciprocal).
        cmax = jnp.max(compat, axis=-1, keepdims=True)
        ex = jnp.exp(compat - cmax)
        denom = jnp.sum(ex, axis=-1, keepdims=True)
        attn = ex * pl.reciprocal(denom, approx=True)

        # Reference re-applies the mask to the attention weights.
        attn = attn * m

        head_outs.append(jnp.dot(attn, vh, preferred_element_type=jnp.float32))

    # Head-major concat == torch's heads.permute(1,2,0,3).view(-1, H*val_dim).
    heads_cat = jnp.concatenate(head_outs, axis=-1)                     # (nq, H*vd)
    out_ref[...] = jnp.dot(heads_cat, wo_ref[...],
                           preferred_element_type=jnp.float32)          # (nq, ed)


def multi_head_attention(q, h, mask, W_query, W_key, W_val, W_out):
    """q: (1, n_query, input_dim), h: (1, graph_size, input_dim) or None."""
    if h is None:
        h = q
    n_heads, input_dim, key_dim = W_query.shape
    val_dim = W_val.shape[2]
    embed_dim = W_out.shape[2]
    n_query = q.shape[1]
    graph_size = h.shape[1]
    norm_factor = 1.0 / math.sqrt(key_dim)

    q2d = q.reshape(-1, input_dim).astype(jnp.float32)
    h2d = h.reshape(-1, input_dim).astype(jnp.float32)
    mask = mask.astype(jnp.float32)

    # One-time trace-time weight re-layout (head-major along columns).
    # norm_factor folded into W_query so the kernel never scales compat.
    wq_all = (jnp.transpose(W_query, (1, 0, 2)) * norm_factor
              ).reshape(input_dim, n_heads * key_dim).astype(jnp.float32)
    wk_all = jnp.transpose(W_key, (1, 0, 2)
                           ).reshape(input_dim, n_heads * key_dim).astype(jnp.float32)
    wv_all = jnp.transpose(W_val, (1, 0, 2)
                           ).reshape(input_dim, n_heads * val_dim).astype(jnp.float32)
    wo_flat = W_out.reshape(n_heads * key_dim, embed_dim).astype(jnp.float32)

    kernel = functools.partial(_mha_kernel, n_heads=n_heads,
                               key_dim=key_dim, val_dim=val_dim)

    # Grid-less call: everything (a few KiB) lives as whole-array VMEM blocks.
    out2d = pl.pallas_call(
        kernel,
        out_shape=jax.ShapeDtypeStruct((n_query, embed_dim), jnp.float32),
        in_specs=[
            pl.BlockSpec((n_query, input_dim), lambda: (0, 0)),
            pl.BlockSpec((graph_size, input_dim), lambda: (0, 0)),
            pl.BlockSpec((n_query, graph_size), lambda: (0, 0)),
            pl.BlockSpec((input_dim, n_heads * key_dim), lambda: (0, 0)),
            pl.BlockSpec((input_dim, n_heads * key_dim), lambda: (0, 0)),
            pl.BlockSpec((input_dim, n_heads * val_dim), lambda: (0, 0)),
            pl.BlockSpec((n_heads * key_dim, embed_dim), lambda: (0, 0)),
        ],
        out_specs=pl.BlockSpec((n_query, embed_dim), lambda: (0, 0)),
    )(q2d, h2d, mask, wq_all, wk_all, wv_all, wo_flat)

    return out2d.reshape(1, n_query, embed_dim)


def reference_mha(q, h, mask, W_query, W_key, W_val, W_out):
    """Pure-JAX mirror of the PyTorch forward (batch_size forced to 1)."""
    if h is None:
        h = q
    n_heads, input_dim, key_dim = W_query.shape
    embed_dim = W_out.shape[2]
    qflat = q.reshape(-1, input_dim)
    hflat = h.reshape(-1, input_dim)
    Q = jnp.einsum('ni,hik->hnk', qflat, W_query)
    K = jnp.einsum('gi,hik->hgk', hflat, W_key)
    V = jnp.einsum('gi,hiv->hgv', hflat, W_val)
    compat = (1.0 / math.sqrt(key_dim)) * jnp.einsum('hnk,hgk->hng', Q, K)
    m = mask.astype(jnp.float32)[None]
    compat = compat * m
    compat = jnp.where(compat == 0.0, -jnp.inf, compat)
    attn = jax.nn.softmax(compat, axis=-1)
    attn = attn * m
    heads = jnp.einsum('hng,hgv->hnv', attn, V)
    out = jnp.einsum('hnv,hve->ne', heads, W_out)
    return out.reshape(1, -1, embed_dim)


if __name__ == "__main__":
    # Small shapes implied by the module: batch=1 (forced), seq=16, hidden=32.
    n_heads, input_dim, embed_dim = 4, 32, 32
    key_dim = embed_dim // n_heads
    val_dim = key_dim
    n_query = graph_size = 16

    root = jax.random.PRNGKey(0)
    k_wq, k_wk, k_wv, k_wo, k_q, k_m = jax.random.split(root, 6)

    # Deterministic init mirroring uniform(-1/sqrt(size(-1)), +1/sqrt(size(-1))).
    s_k = 1.0 / math.sqrt(key_dim)
    s_v = 1.0 / math.sqrt(val_dim)
    s_e = 1.0 / math.sqrt(embed_dim)
    W_query = jax.random.uniform(k_wq, (n_heads, input_dim, key_dim),
                                 jnp.float32, -s_k, s_k)
    W_key = jax.random.uniform(k_wk, (n_heads, input_dim, key_dim),
                               jnp.float32, -s_k, s_k)
    W_val = jax.random.uniform(k_wv, (n_heads, input_dim, val_dim),
                               jnp.float32, -s_v, s_v)
    W_out = jax.random.uniform(k_wo, (n_heads, key_dim, embed_dim),
                               jnp.float32, -s_e, s_e)

    q = jax.random.normal(k_q, (1, n_query, input_dim), jnp.float32)
    h = None  # self-attention, as in the reference when h is None

    # {0,1} mask; keep at least one 1 per row so no softmax row is all -inf.
    mask = (jax.random.uniform(k_m, (n_query, graph_size)) < 0.7
            ).astype(jnp.float32)
    mask = mask.at[:, 0].set(1.0)

    out = multi_head_attention(q, h, mask, W_query, W_key, W_val, W_out)
    out = jax.block_until_ready(out)

    ref = reference_mha(q, h, mask, W_query, W_key, W_val, W_out)
    assert out.shape == (1, n_query, embed_dim)
    # Tolerance covers the EUP approx reciprocal (~bf16-accurate) used for the
    # softmax denominator; structural/semantic errors would be O(0.1) or larger.
    assert jnp.allclose(out, ref, atol=5e-3, rtol=5e-3), (
        float(jnp.max(jnp.abs(out - ref))))

    print("KERNEL_OK")
</pallas_src>

<mosaic_0001>
module attributes {stable_mosaic.version = 11 : i64} {
  func.func @_mha_kernel(%arg0: memref<16x32xf32, #tpu.memory_space<vmem>>, %arg1: memref<16x32xf32, #tpu.memory_space<vmem>>, %arg2: memref<16x16xf32, #tpu.memory_space<vmem>>, %arg3: memref<32x32xf32, #tpu.memory_space<vmem>>, %arg4: memref<32x32xf32, #tpu.memory_space<vmem>>, %arg5: memref<32x32xf32, #tpu.memory_space<vmem>>, %arg6: memref<32x32xf32, #tpu.memory_space<vmem>>, %arg7: memref<16x32xf32, #tpu.memory_space<vmem>>) attributes {dimension_semantics = [], scalar_prefetch = 0 : i64, scratch_operands = 0 : i64, tpu.core_type = #tpu.core_type<tc>} {
    %c0 = arith.constant 0 : index
    %c0_0 = arith.constant 0 : index
    %0 = vector.load %arg0[%c0, %c0_0] : memref<16x32xf32, #tpu.memory_space<vmem>>, vector<16x32xf32>
    %c0_1 = arith.constant 0 : index
    %c0_2 = arith.constant 0 : index
    %1 = vector.load %arg1[%c0_1, %c0_2] : memref<16x32xf32, #tpu.memory_space<vmem>>, vector<16x32xf32>
    %c0_3 = arith.constant 0 : index
    %c0_4 = arith.constant 0 : index
    %2 = vector.load %arg2[%c0_3, %c0_4] : memref<16x16xf32, #tpu.memory_space<vmem>>, vector<16x16xf32>
    %c0_5 = arith.constant 0 : index
    %c0_6 = arith.constant 0 : index
    %3 = vector.load %arg3[%c0_5, %c0_6] : memref<32x32xf32, #tpu.memory_space<vmem>>, vector<32x32xf32>
    %cst = arith.constant dense<0.000000e+00> : vector<16x32xf32>
    %4 = tpu.matmul %0, %3, %cst {dimension_numbers = #tpu.dot_dimension_numbers<[1], [0], [0], [1], [0, 0, 1, 1], [], []>} : vector<16x32xf32>, vector<32x32xf32>, vector<16x32xf32> -> vector<16x32xf32>
    %c0_7 = arith.constant 0 : index
    %c0_8 = arith.constant 0 : index
    %5 = vector.load %arg4[%c0_7, %c0_8] : memref<32x32xf32, #tpu.memory_space<vmem>>, vector<32x32xf32>
    %cst_9 = arith.constant dense<0.000000e+00> : vector<16x32xf32>
    %6 = tpu.matmul %1, %5, %cst_9 {dimension_numbers = #tpu.dot_dimension_numbers<[1], [0], [0], [1], [0, 0, 1, 1], [], []>} : vector<16x32xf32>, vector<32x32xf32>, vector<16x32xf32> -> vector<16x32xf32>
    %c0_10 = arith.constant 0 : index
    %c0_11 = arith.constant 0 : index
    %7 = vector.load %arg5[%c0_10, %c0_11] : memref<32x32xf32, #tpu.memory_space<vmem>>, vector<32x32xf32>
    %cst_12 = arith.constant dense<0.000000e+00> : vector<16x32xf32>
    %8 = tpu.matmul %1, %7, %cst_12 {dimension_numbers = #tpu.dot_dimension_numbers<[1], [0], [0], [1], [0, 0, 1, 1], [], []>} : vector<16x32xf32>, vector<32x32xf32>, vector<16x32xf32> -> vector<16x32xf32>
    %9 = vector.extract_strided_slice %4 {offsets = [0, 0], sizes = [16, 8], strides = [1, 1]} : vector<16x32xf32> to vector<16x8xf32>
    %10 = vector.extract_strided_slice %6 {offsets = [0, 0], sizes = [16, 8], strides = [1, 1]} : vector<16x32xf32> to vector<16x8xf32>
    %11 = vector.extract_strided_slice %8 {offsets = [0, 0], sizes = [16, 8], strides = [1, 1]} : vector<16x32xf32> to vector<16x8xf32>
    %cst_13 = arith.constant dense<0.000000e+00> : vector<16x16xf32>
    %12 = tpu.matmul %9, %10, %cst_13 {dimension_numbers = #tpu.dot_dimension_numbers<[1], [1], [0], [0], [0, 0, 1, 0], [], []>} : vector<16x8xf32>, vector<16x8xf32>, vector<16x16xf32> -> vector<16x16xf32>
    %13 = arith.mulf %12, %2 : vector<16x16xf32>
    %cst_14 = arith.constant 0.000000e+00 : f32
    %14 = vector.broadcast %cst_14 : f32 to vector<16x16xf32>
    %15 = arith.cmpf oeq, %13, %14 : vector<16x16xf32>
    %cst_15 = arith.constant 0xFF800000 : f32
    %16 = vector.broadcast %cst_15 : f32 to vector<16x16xf32>
    %17 = arith.select %15, %16, %13 : vector<16x16xi1>, vector<16x16xf32>
    %cst_16 = arith.constant dense<0xFF800000> : vector<16xf32>
    %18 = vector.multi_reduction <maximumf>, %17, %cst_16 [1] : vector<16x16xf32> to vector<16xf32>
    %19 = vector.shape_cast %18 : vector<16xf32> to vector<16x1xf32>
    %20 = vector.broadcast %19 : vector<16x1xf32> to vector<16x16xf32>
    %21 = arith.subf %17, %20 : vector<16x16xf32>
    %22 = math.exp %21 : vector<16x16xf32>
    %cst_17 = arith.constant dense<0.000000e+00> : vector<16xf32>
    %23 = vector.multi_reduction <add>, %22, %cst_17 [1] : vector<16x16xf32> to vector<16xf32>
    %24 = vector.shape_cast %23 : vector<16xf32> to vector<16x1xf32>
    %25 = tpu.reciprocal %24 {approx = true} : vector<16x1xf32> -> vector<16x1xf32>
    %26 = vector.broadcast %25 : vector<16x1xf32> to vector<16x16xf32>
    %27 = arith.mulf %22, %26 : vector<16x16xf32>
    %28 = arith.mulf %27, %2 : vector<16x16xf32>
    %cst_18 = arith.constant dense<0.000000e+00> : vector<16x8xf32>
    %29 = tpu.matmul %28, %11, %cst_18 {dimension_numbers = #tpu.dot_dimension_numbers<[1], [0], [0], [1], [0, 0, 1, 1], [], []>} : vector<16x16xf32>, vector<16x8xf32>, vector<16x8xf32> -> vector<16x8xf32>
    %30 = vector.extract_strided_slice %4 {offsets = [0, 8], sizes = [16, 8], strides = [1, 1]} : vector<16x32xf32> to vector<16x8xf32>
    %31 = vector.extract_strided_slice %6 {offsets = [0, 8], sizes = [16, 8], strides = [1, 1]} : vector<16x32xf32> to vector<16x8xf32>
    %32 = vector.extract_strided_slice %8 {offsets = [0, 8], sizes = [16, 8], strides = [1, 1]} : vector<16x32xf32> to vector<16x8xf32>
    %cst_19 = arith.constant dense<0.000000e+00> : vector<16x16xf32>
    %33 = tpu.matmul %30, %31, %cst_19 {dimension_numbers = #tpu.dot_dimension_numbers<[1], [1], [0], [0], [0, 0, 1, 0], [], []>} : vector<16x8xf32>, vector<16x8xf32>, vector<16x16xf32> -> vector<16x16xf32>
    %34 = arith.mulf %33, %2 : vector<16x16xf32>
    %cst_20 = arith.constant 0.000000e+00 : f32
    %35 = vector.broadcast %cst_20 : f32 to vector<16x16xf32>
    %36 = arith.cmpf oeq, %34, %35 : vector<16x16xf32>
    %cst_21 = arith.constant 0xFF800000 : f32
    %37 = vector.broadcast %cst_21 : f32 to vector<16x16xf32>
    %38 = arith.select %36, %37, %34 : vector<16x16xi1>, vector<16x16xf32>
    %cst_22 = arith.constant dense<0xFF800000> : vector<16xf32>
    %39 = vector.multi_reduction <maximumf>, %38, %cst_22 [1] : vector<16x16xf32> to vector<16xf32>
    %40 = vector.shape_cast %39 : vector<16xf32> to vector<16x1xf32>
    %41 = vector.broadcast %40 : vector<16x1xf32> to vector<16x16xf32>
    %42 = arith.subf %38, %41 : vector<16x16xf32>
    %43 = math.exp %42 : vector<16x16xf32>
    %cst_23 = arith.constant dense<0.000000e+00> : vector<16xf32>
    %44 = vector.multi_reduction <add>, %43, %cst_23 [1] : vector<16x16xf32> to vector<16xf32>
    %45 = vector.shape_cast %44 : vector<16xf32> to vector<16x1xf32>
    %46 = tpu.reciprocal %45 {approx = true} : vector<16x1xf32> -> vector<16x1xf32>
    %47 = vector.broadcast %46 : vector<16x1xf32> to vector<16x16xf32>
    %48 = arith.mulf %43, %47 : vector<16x16xf32>
    %49 = arith.mulf %48, %2 : vector<16x16xf32>
    %cst_24 = arith.constant dense<0.000000e+00> : vector<16x8xf32>
    %50 = tpu.matmul %49, %32, %cst_24 {dimension_numbers = #tpu.dot_dimension_numbers<[1], [0], [0], [1], [0, 0, 1, 1], [], []>} : vector<16x16xf32>, vector<16x8xf32>, vector<16x8xf32> -> vector<16x8xf32>
    %51 = vector.extract_strided_slice %4 {offsets = [0, 16], sizes = [16, 8], strides = [1, 1]} : vector<16x32xf32> to vector<16x8xf32>
    %52 = vector.extract_strided_slice %6 {offsets = [0, 16], sizes = [16, 8], strides = [1, 1]} : vector<16x32xf32> to vector<16x8xf32>
    %53 = vector.extract_strided_slice %8 {offsets = [0, 16], sizes = [16, 8], strides = [1, 1]} : vector<16x32xf32> to vector<16x8xf32>
    %cst_25 = arith.constant dense<0.000000e+00> : vector<16x16xf32>
    %54 = tpu.matmul %51, %52, %cst_25 {dimension_numbers = #tpu.dot_dimension_numbers<[1], [1], [0], [0], [0, 0, 1, 0], [], []>} : vector<16x8xf32>, vector<16x8xf32>, vector<16x16xf32> -> vector<16x16xf32>
    %55 = arith.mulf %54, %2 : vector<16x16xf32>
    %cst_26 = arith.constant 0.000000e+00 : f32
    %56 = vector.broadcast %cst_26 : f32 to vector<16x16xf32>
    %57 = arith.cmpf oeq, %55, %56 : vector<16x16xf32>
    %cst_27 = arith.constant 0xFF800000 : f32
    %58 = vector.broadcast %cst_27 : f32 to vector<16x16xf32>
    %59 = arith.select %57, %58, %55 : vector<16x16xi1>, vector<16x16xf32>
    %cst_28 = arith.constant dense<0xFF800000> : vector<16xf32>
    %60 = vector.multi_reduction <maximumf>, %59, %cst_28 [1] : vector<16x16xf32> to vector<16xf32>
    %61 = vector.shape_cast %60 : vector<16xf32> to vector<16x1xf32>
    %62 = vector.broadcast %61 : vector<16x1xf32> to vector<16x16xf32>
    %63 = arith.subf %59, %62 : vector<16x16xf32>
    %64 = math.exp %63 : vector<16x16xf32>
    %cst_29 = arith.constant dense<0.000000e+00> : vector<16xf32>
    %65 = vector.multi_reduction <add>, %64, %cst_29 [1] : vector<16x16xf32> to vector<16xf32>
    %66 = vector.shape_cast %65 : vector<16xf32> to vector<16x1xf32>
    %67 = tpu.reciprocal %66 {approx = true} : vector<16x1xf32> -> vector<16x1xf32>
    %68 = vector.broadcast %67 : vector<16x1xf32> to vector<16x16xf32>
    %69 = arith.mulf %64, %68 : vector<16x16xf32>
    %70 = arith.mulf %69, %2 : vector<16x16xf32>
    %cst_30 = arith.constant dense<0.000000e+00> : vector<16x8xf32>
    %71 = tpu.matmul %70, %53, %cst_30 {dimension_numbers = #tpu.dot_dimension_numbers<[1], [0], [0], [1], [0, 0, 1, 1], [], []>} : vector<16x16xf32>, vector<16x8xf32>, vector<16x8xf32> -> vector<16x8xf32>
    %72 = vector.extract_strided_slice %4 {offsets = [0, 24], sizes = [16, 8], strides = [1, 1]} : vector<16x32xf32> to vector<16x8xf32>
    %73 = vector.extract_strided_slice %6 {offsets = [0, 24], sizes = [16, 8], strides = [1, 1]} : vector<16x32xf32> to vector<16x8xf32>
    %74 = vector.extract_strided_slice %8 {offsets = [0, 24], sizes = [16, 8], strides = [1, 1]} : vector<16x32xf32> to vector<16x8xf32>
    %cst_31 = arith.constant dense<0.000000e+00> : vector<16x16xf32>
    %75 = tpu.matmul %72, %73, %cst_31 {dimension_numbers = #tpu.dot_dimension_numbers<[1], [1], [0], [0], [0, 0, 1, 0], [], []>} : vector<16x8xf32>, vector<16x8xf32>, vector<16x16xf32> -> vector<16x16xf32>
    %76 = arith.mulf %75, %2 : vector<16x16xf32>
    %cst_32 = arith.constant 0.000000e+00 : f32
    %77 = vector.broadcast %cst_32 : f32 to vector<16x16xf32>
    %78 = arith.cmpf oeq, %76, %77 : vector<16x16xf32>
    %cst_33 = arith.constant 0xFF800000 : f32
    %79 = vector.broadcast %cst_33 : f32 to vector<16x16xf32>
    %80 = arith.select %78, %79, %76 : vector<16x16xi1>, vector<16x16xf32>
    %cst_34 = arith.constant dense<0xFF800000> : vector<16xf32>
    %81 = vector.multi_reduction <maximumf>, %80, %cst_34 [1] : vector<16x16xf32> to vector<16xf32>
    %82 = vector.shape_cast %81 : vector<16xf32> to vector<16x1xf32>
    %83 = vector.broadcast %82 : vector<16x1xf32> to vector<16x16xf32>
    %84 = arith.subf %80, %83 : vector<16x16xf32>
    %85 = math.exp %84 : vector<16x16xf32>
    %cst_35 = arith.constant dense<0.000000e+00> : vector<16xf32>
    %86 = vector.multi_reduction <add>, %85, %cst_35 [1] : vector<16x16xf32> to vector<16xf32>
    %87 = vector.shape_cast %86 : vector<16xf32> to vector<16x1xf32>
    %88 = tpu.reciprocal %87 {approx = true} : vector<16x1xf32> -> vector<16x1xf32>
    %89 = vector.broadcast %88 : vector<16x1xf32> to vector<16x16xf32>
    %90 = arith.mulf %85, %89 : vector<16x16xf32>
    %91 = arith.mulf %90, %2 : vector<16x16xf32>
    %cst_36 = arith.constant dense<0.000000e+00> : vector<16x8xf32>
    %92 = tpu.matmul %91, %74, %cst_36 {dimension_numbers = #tpu.dot_dimension_numbers<[1], [0], [0], [1], [0, 0, 1, 1], [], []>} : vector<16x16xf32>, vector<16x8xf32>, vector<16x8xf32> -> vector<16x8xf32>
    %93 = tpu.concatenate %29, %50, %71, %92 in 1 : vector<16x8xf32>, vector<16x8xf32>, vector<16x8xf32>, vector<16x8xf32> -> vector<16x32xf32>
    %c0_37 = arith.constant 0 : index
    %c0_38 = arith.constant 0 : index
    %94 = vector.load %arg6[%c0_37, %c0_38] : memref<32x32xf32, #tpu.memory_space<vmem>>, vector<32x32xf32>
    %cst_39 = arith.constant dense<0.000000e+00> : vector<16x32xf32>
    %95 = tpu.matmul %93, %94, %cst_39 {dimension_numbers = #tpu.dot_dimension_numbers<[1], [0], [0], [1], [0, 0, 1, 1], [], []>} : vector<16x32xf32>, vector<32x32xf32>, vector<16x32xf32> -> vector<16x32xf32>
    %c0_40 = arith.constant 0 : index
    %c0_41 = arith.constant 0 : index
    %96 = vector.load %arg7[%c0_40, %c0_41] : memref<16x32xf32, #tpu.memory_space<vmem>>, vector<16x32xf32>
    tpu.vector_store %arg7[%c0_40, %c0_41], %95 {strides = array<i32>} : memref<16x32xf32, #tpu.memory_space<vmem>>, vector<16x32xf32>,
    return
  }
}

</mosaic_0001>

<bundles_post_ra>
// kernel: tpu_custom_call.1
= control target key start
LH: loop header
LB: loop body
LE: loop exit
PB: predicated region body
PF: predicated region fallthrough
CT: control target
= control target key end

     0   :  { %12 = vsyncpa [#allocation3], 0  ;;  %s2197_s0 = inlined_call_operand.hbm [shape: f32[16,32], index: 0, kind: input, shape index: {}]   ;;  %s2198_s1 = inlined_call_operand.hbm [shape: f32[16,32], index: 1, kind: input, shape index: {}]   ;;  %s2199_s2 = inlined_call_operand.hbm [shape: f32[16,16], index: 2, kind: input, shape index: {}]   ;;  %s2200_s3 = inlined_call_operand.hbm [shape: f32[32,32], index: 3, kind: input, shape index: {}]   ;;  %s2201_s4 = inlined_call_operand.hbm [shape: f32[32,32], index: 4, kind: input, shape index: {}]   ;;  %s2202_s5 = inlined_call_operand.hbm [shape: f32[32,32], index: 5, kind: input, shape index: {}]   ;;  %s2203_s6 = inlined_call_operand.hbm [shape: f32[32,32], index: 6, kind: input, shape index: {}]   ;;  %s2204_s7 = inlined_call_operand.hbm [shape: f32[16,32], index: 7, kind: output, shape index: {}]  }
   0x1   :  { %13 = vsyncpa [#allocation6], 0 }
   0x2   :  { %14 = vsyncpa [#allocation9], 0 }
   0x3   :  { %15 = vsyncpa [#allocation12], 0 }
   0x4   :  { %16 = vsyncpa [#allocation4], 0  ;;  %s1865_s24 = smov [#allocation5]   ;;  %s1866_s26 = smov [#allocation8]  }
   0x5   :  { %s34_s25 = sshll.u32 %s1865_s24, 4  ;;  %s58_s27 = sshll.u32 %s1866_s26, 4  ;;  %s35_s25 = int_to_ptr.vmem [resolvable:$true] %s34_s25  ;;  %s1920_s27 = int_to_ptr.vmem [resolvable:$true] %s58_s27 }
   0x6   :  { %s1679_s30 = scalar_lea.hbm %s2198_s1, 256 }
   0x7   :  { %p1680_p0 = scmp.ne.s32.totalorder %s2198_s1, %s1679_s30  ;;  %p1683_p1 = scmp.lt.u32.totalorder %s1679_s30, %s2198_s1 }
   0x9   :  { %p1685_p2 = pnand %p1683_p1, %p1680_p0 }
   0xb   :  { %1688 = shalt.err (!%p1685_p2)
}
   0xc   :  { %s1689_s12 = scalar_lea.vmem %s35_s25, 256  ;;  %p1694_p4 = scmp.lt.s32.totalorder %s35_s25, %s35_s25 }
   0xd   :  { %p1690_p3 = scmp.ne.s32.totalorder %s35_s25, %s1689_s12  ;;  %p1695_p5 = scmp.lt.s32.totalorder %s1689_s12, %s1689_s12 }
   0xf   :  { %p1696_p6 = por %p1695_p5, %p1694_p4 }
  0x11   :  { %p1697_p7 = pnand %p1696_p6, %p1690_p3 }
  0x13   :  { %1700 = shalt.err (!%p1697_p7)
}
  0x14   :  { %s1867_s13 = smov 128   ;;  %s1868_s14 = smov 8  }
  0x15   :  { %40 = dma.hbm_to_vmem [thread:$0]  %s2198_s1, 256, %s35_s25, [#allocation6], %s1867_s13, %s1867_s13, %s1868_s14  }
  0x16   :  { %s1701_s19 = scalar_lea.hbm %s2200_s3, 512 }
  0x17   :  { %p1702_p8 = scmp.ne.s32.totalorder %s2200_s3, %s1701_s19  ;;  %p1705_p9 = scmp.lt.u32.totalorder %s1701_s19, %s2200_s3 }
  0x19   :  { %p1707_p10 = pnand %p1705_p9, %p1702_p8 }
  0x1b   :  { %1710 = shalt.err (!%p1707_p10)
}
  0x1c   :  { %s1711_s24 = scalar_lea.vmem %s1920_s27, 512  ;;  %p1716_p12 = scmp.lt.s32.totalorder %s1920_s27, %s1920_s27 }
  0x1d   :  { %p1712_p11 = scmp.ne.s32.totalorder %s1920_s27, %s1711_s24  ;;  %p1717_p13 = scmp.lt.s32.totalorder %s1711_s24, %s1711_s24 }
  0x1f   :  { %p1718_p0 = por %p1717_p13, %p1716_p12 }
  0x21   :  { %p1719_p1 = pnand %p1718_p0, %p1712_p11 }
  0x23   :  { %1722 = shalt.err (!%p1719_p1)
}
  0x24   :  { %64 = dma.hbm_to_vmem [thread:$0]  %s2200_s3, 512, %s1920_s27, [#allocation9], %s1867_s13, %s1867_s13, %s1868_s14  }
  0x25   :  { %s1869_s26 = smov [#allocation11]   ;;  %s1870_s29 = smov [#allocation2]  }
  0x26   :  { %s82_s28 = sshll.u32 %s1869_s26, 4  ;;  %s22_s30 = sshll.u32 %s1870_s29, 4  ;;  %s83_s28 = int_to_ptr.vmem [resolvable:$true] %s82_s28  ;;  %s1957_s30 = int_to_ptr.vmem [resolvable:$true] %s22_s30 }
  0x27   :  { %s1723_s10 = scalar_lea.hbm %s2202_s5, 512 }
  0x28   :  { %p1724_p2 = scmp.ne.s32.totalorder %s2202_s5, %s1723_s10  ;;  %p1727_p3 = scmp.lt.u32.totalorder %s1723_s10, %s2202_s5 }
  0x2a   :  { %p1729_p4 = pnand %p1727_p3, %p1724_p2 }
  0x2c   :  { %1732 = shalt.err (!%p1729_p4)
}
  0x2d   :  { %s1733_s3 = scalar_lea.vmem %s83_s28, 512  ;;  %p1738_p6 = scmp.lt.s32.totalorder %s83_s28, %s83_s28 }
  0x2e   :  { %p1734_p5 = scmp.ne.s32.totalorder %s83_s28, %s1733_s3  ;;  %p1739_p7 = scmp.lt.s32.totalorder %s1733_s3, %s1733_s3 }
  0x30   :  { %p1740_p8 = por %p1739_p7, %p1738_p6 }
  0x32   :  { %p1741_p9 = pnand %p1740_p8, %p1734_p5 }
  0x34   :  { %1744 = shalt.err (!%p1741_p9)
}
  0x35   :  { %88 = dma.hbm_to_vmem [thread:$0]  %s2202_s5, 512, %s83_s28, [#allocation12], %s1867_s13, %s1867_s13, %s1868_s14  }
  0x36   :  { %s1745_s20 = scalar_lea.hbm %s2197_s0, 256 }
  0x37   :  { %p1746_p10 = scmp.ne.s32.totalorder %s2197_s0, %s1745_s20  ;;  %p1749_p11 = scmp.lt.u32.totalorder %s1745_s20, %s2197_s0 }
  0x39   :  { %p1751_p12 = pnand %p1749_p11, %p1746_p10 }
  0x3b   :  { %1754 = shalt.err (!%p1751_p12)
}
  0x3c   :  { %s1755_s1 = scalar_lea.vmem %s1957_s30, 256  ;;  %p1760_p0 = scmp.lt.s32.totalorder %s1957_s30, %s1957_s30 }
  0x3d   :  { %p1756_p13 = scmp.ne.s32.totalorder %s1957_s30, %s1755_s1  ;;  %p1761_p1 = scmp.lt.s32.totalorder %s1755_s1, %s1755_s1 }
  0x3f   :  { %p1762_p2 = por %p1761_p1, %p1760_p0 }
  0x41   :  { %p1763_p3 = pnand %p1762_p2, %p1756_p13 }
  0x43   :  { %1766 = shalt.err (!%p1763_p3)
}
  0x44   :  { %28 = dma.hbm_to_vmem [thread:$0]  %s2197_s0, 256, %s1957_s30, [#allocation3], %s1867_s13, %s1867_s13, %s1868_s14  }
  0x45   :  { %s1871_s26 = smov [#allocation7]   ;;  %s1872_s29 = smov [#allocation10]  }
  0x46   :  { %s46_s28 = sshll.u32 %s1871_s26, 4  ;;  %s70_s8 = sshll.u32 %s1872_s29, 4  ;;  %s47_s28 = int_to_ptr.vmem [resolvable:$true] %s46_s28  ;;  %s1994_s8 = int_to_ptr.vmem [resolvable:$true] %s70_s8 }
  0x47   :  { %s1767_s11 = scalar_lea.hbm %s2199_s2, 256 }
  0x48   :  { %p1768_p4 = scmp.ne.s32.totalorder %s2199_s2, %s1767_s11  ;;  %p1771_p5 = scmp.lt.u32.totalorder %s1767_s11, %s2199_s2 }
  0x4a   :  { %p1773_p6 = pnand %p1771_p5, %p1768_p4 }
  0x4c   :  { %1776 = shalt.err (!%p1773_p6)
}
  0x4d   :  { %s1777_s0 = scalar_lea.vmem %s47_s28, 256  ;;  %p1782_p8 = scmp.lt.s32.totalorder %s47_s28, %s47_s28 }
  0x4e   :  { %p1778_p7 = scmp.ne.s32.totalorder %s47_s28, %s1777_s0  ;;  %p1783_p9 = scmp.lt.s32.totalorder %s1777_s0, %s1777_s0 }
  0x50   :  { %p1784_p10 = por %p1783_p9, %p1782_p8 }
  0x52   :  { %p1785_p11 = pnand %p1784_p10, %p1778_p7 }
  0x54   :  { %1788 = shalt.err (!%p1785_p11)
}
  0x55   :  { %52 = dma.hbm_to_vmem [thread:$0]  %s2199_s2, 256, %s47_s28, [#allocation6], %s1867_s13, %s1867_s13, %s1868_s14  }
  0x56   :  { %s1789_s19 = scalar_lea.hbm %s2201_s4, 512 }
  0x57   :  { %p1790_p12 = scmp.ne.s32.totalorder %s2201_s4, %s1789_s19  ;;  %p1793_p13 = scmp.lt.u32.totalorder %s1789_s19, %s2201_s4 }
  0x59   :  { %p1795_p0 = pnand %p1793_p13, %p1790_p12 }
  0x5b   :  { %1798 = shalt.err (!%p1795_p0)
}
  0x5c   :  { %s1799_s24 = scalar_lea.vmem %s1994_s8, 512  ;;  %p1804_p2 = scmp.lt.s32.totalorder %s1994_s8, %s1994_s8 }
  0x5d   :  { %p1800_p1 = scmp.ne.s32.totalorder %s1994_s8, %s1799_s24  ;;  %p1805_p3 = scmp.lt.s32.totalorder %s1799_s24, %s1799_s24 }
  0x5f   :  { %p1806_p4 = por %p1805_p3, %p1804_p2 }
  0x61   :  { %p1807_p5 = pnand %p1806_p4, %p1800_p1 }
  0x63   :  { %1810 = shalt.err (!%p1807_p5)
}
  0x64   :  { %76 = dma.hbm_to_vmem [thread:$0]  %s2201_s4, 512, %s1994_s8, [#allocation9], %s1867_s13, %s1867_s13, %s1868_s14  }
  0x65   :  { %s1873_s5 = smov [#allocation13]   ;;  %s1811_s29 = scalar_lea.hbm %s2203_s6, 512 }
  0x66   :  { %s94_s25 = sshll.u32 %s1873_s5, 4  ;;  %p1812_p6 = scmp.ne.s32.totalorder %s2203_s6, %s1811_s29  ;;  %s95_s25 = int_to_ptr.vmem [resolvable:$true] %s94_s25 }
  0x67   :  { %p1815_p7 = scmp.lt.u32.totalorder %s1811_s29, %s2203_s6 }
  0x69   :  { %p1817_p8 = pnand %p1815_p7, %p1812_p6 }
  0x6b   :  { %1820 = shalt.err (!%p1817_p8)
}
  0x6c   :  { %s1821_s15 = scalar_lea.vmem %s95_s25, 512  ;;  %p1826_p10 = scmp.lt.s32.totalorder %s95_s25, %s95_s25 }
  0x6d   :  { %p1822_p9 = scmp.ne.s32.totalorder %s95_s25, %s1821_s15  ;;  %p1827_p11 = scmp.lt.s32.totalorder %s1821_s15, %s1821_s15 }
  0x6f   :  { %p1828_p12 = por %p1827_p11, %p1826_p10 }
  0x71   :  { %p1829_p13 = pnand %p1828_p12, %p1822_p9 }
  0x73   :  { %1832 = shalt.err (!%p1829_p13)
}
  0x74   :  { %100 = dma.hbm_to_vmem [thread:$0]  %s2203_s6, 512, %s95_s25, [#allocation12], %s1867_s13, %s1867_s13, %s1868_s14  }
  0x75   :  { %1855 = dma.done.wait [#allocation3], 256  }
  0x76   :  { %1856 = vsyncadd [#allocation3], 4294967040 }
  0x77   :  { %1857 = dma.done.wait [#allocation6], 512  }
  0x78   :  { %1858 = vsyncadd [#allocation6], 4294966784 }
  0x79   :  { %1859 = dma.done.wait [#allocation9], 1024  }
  0x7a   :  { %1860 = vsyncadd [#allocation9], 4294966272 }
  0x7b   :  { %1861 = dma.done.wait [#allocation12], 1024  }
  0x7c   :  { %1862 = vsyncadd [#allocation12], 4294966272  ;;  %vm132_vm0 = vcmask 261120   ;;  %v214_v0 = vld [vmem:[#allocation10] sm:$0xff]  ;;  %v215_v1 = vld [vmem:[#allocation10 + $0x8] sm:$0xff]  ;;  %vm378_vm1 = vcmask 64512  }
  0x7d   :  { %v216_v2 = vld [vmem:[#allocation10 + $0x10] sm:$0xff]  ;;  %v1538_v3 = vpack.c.bf16 %v215_v1, %v214_v0  ;;  %v217_v4 = vld [vmem:[#allocation10 + $0x18] sm:$0xff]  ;;  %v124_v5 = vld [vmem:[#allocation5] sm:$0xff]  ;;  %vm472_vm3 = vcmask 130048   ;;  %s1874_s6 = smov 120   ;;  %s1875_s16 = smov 112  }
  0x7e   :  { %v128_v6 = vld [vmem:[#allocation8] sm:$0xff]  ;;  %v1542_v7 = vpack.c.bf16 %v217_v4, %v216_v2  ;;  %1449 = vmatprep.mubr.msk.f32.mxu1 %vm132_vm0, %v124_v5  ;;  %v129_v8 = vld [vmem:[#allocation8 + $0x8] sm:$0xff]  ;;  %v130_v9 = vld [vmem:[#allocation8 + $0x10] sm:$0xff]  ;;  %s1876_s3 = smov 104   ;;  %s1877_s0 = smov 16   ;;  %vm1232_vm12 = vcmask 195584  }
  0x7f   :  { %1539 = vmatprep.subr.bf16.mxu1 %v1538_v3  ;;  %v1530_v10 = vpack.c.bf16 %v129_v8, %v128_v6  ;;  %v131_v11 = vld [vmem:[#allocation8 + $0x18] sm:$0xff]  ;;  %v122_v12 = vld [vmem:[#allocation2] sm:$0xff]  ;;  %v125_v14 = vld [vmem:[#allocation5 + $0x8] sm:$0xff]  ;;  %s1878_s30 = smov 24   ;;  %s1879_s27 = smov [#allocation14]  }
  0x80   :  { %1541 = vmatpush3.bf16.msra.mxu1 %v1538_v3  ;;  %v1534_v13 = vpack.c.bf16 %v131_v11, %v130_v9  ;;  %1438 = vmatprep.mubr.msk.f32.mxu0 %vm132_vm0, %v122_v12  ;;  %v123_v15 = vld [vmem:[#allocation2 + $0x8] sm:$0xff]  ;;  %v299_v16 = vld [vmem:[#allocation11] sm:$0xff]  ;;  %v300_v17 = vld [vmem:[#allocation11 + $0x8] sm:$0xff]  ;;  %s1327_s17 = sshll.u32 %s1879_s27, 4  ;;  %s1328_s17 = int_to_ptr.vmem [resolvable:$true] %s1327_s17 }
  0x81   :  { %1543 = vmatprep.subr.bf16.mxu1 %v1542_v7  ;;  %1531 = vmatprep.subr.bf16.mxu0 %v1530_v10  ;;  %v301_v18 = vld [vmem:[#allocation11 + $0x10] sm:$0xff]  ;;  %v1546_v19 = vpack.c.bf16 %v300_v17, %v299_v16  ;;  %v302_v20 = vld [vmem:[#allocation11 + $0x18] sm:$0xff]  ;;  %vm2054_vm2 = vmpackc.low %vm378_vm1, %vm378_vm1  ;;  %s1833_s18 = scalar_lea.vmem %s1328_s17, 256  ;;  %p1838_p1 = scmp.lt.s32.totalorder %s1328_s17, %s1328_s17 }
  0x82   :  { %1533 = vmatpush3.bf16.msra.mxu0 %v1530_v10  ;;  %v1550_v21 = vpack.c.bf16 %v302_v20, %v301_v18  ;;  %v2072_v29 = vld [vmem:[#allocation7 + $0x8] sm:$0xff]  ;;  %v2074_v30 = vld [vmem:[#allocation7] sm:$0xff]  ;;  %p1834_p0 = scmp.ne.s32.totalorder %s1328_s17, %s1833_s18  ;;  %p1839_p2 = scmp.lt.s32.totalorder %s1833_s18, %s1833_s18 }
  0x83   :  { %1535 = vmatprep.subr.bf16.mxu0 %v1534_v13 }
  0x84   :  { %1545 = vmatpush3.bf16.msra.mxu1 %v1542_v7  ;;  %p1840_p3 = por %p1839_p2, %p1838_p1 }
  0x86   :  { %1537 = vmatpush3.bf16.msra.mxu0 %v1534_v13  ;;  %p1841_p4 = pnand %p1840_p3, %p1834_p0 }
  0x87   :  { %1450 = vmatmul.mubr.msk.f32.vlgmr.msra.gmra.mrb[0].mxu1 %vm132_vm0, %v125_v14  ;;  %1547 = vmatprep.subr.bf16.mxu0 %v1546_v19 }
  0x89   :  { %1439 = vmatmul.mubr.msk.f32.vlgmr.msra.gmra.mrb[0].mxu0 %vm132_vm0, %v123_v15 }
  0x8a   :  { %1460 = vmatprep.mubr.msk.f32.mxu0 %vm132_vm0, %v124_v5  ;;  %1549 = vmatpush3.bf16.msra.mxu0 %v1546_v19 }
  0x8b   :  { %1551 = vmatprep.subr.bf16.mxu0 %v1550_v21 }
  0x8e   :  { %1553 = vmatpush3.bf16.msra.mxu0 %v1550_v21 }
  0x91   :  { %1461 = vmatmul.mubr.msk.f32.vlgmr.msra.gmra.mrb[2].mxu0 %vm132_vm0, %v125_v14 }
 0x15a   :  { %v1451_v22 = vpop.f32.mrb[0].mxu1 }
 0x15b   :  { %v290_v23 = vpop.f32.mrb[1].mxu1 }
 0x15c   :  { %v1554_v25 = vpack.c.bf16 %v1451_v22, %v290_v23  ;;  %v2058_v26 = vpop.f32.mrb[0].mxu0  ;;  %v2060_v27 = vpack.i.bf16 %v1451_v22, %v290_v23 }
 0x15d   :  { %v2062_v28 = vpop.f32.mrb[1].mxu0 }
 0x15e   :  { %1556 = vmatprep.subr.msk.bf16.mxu1 %vm2054_vm2, %v1554_v25  ;;  %1467 = vmatprep.mubr.msk.f32.mxu1 %vm378_vm1, %v2062_v28 }
 0x15f   :  { %1559 = vmatpush3.bf16.xpose.msk.msra.mxu1 %vm2054_vm2, %v1554_v25 }
 0x164   :  { %v1462_v39 = vpop.f32.mrb[2].mxu0 }
 0x165   :  { %v369_v40 = vpop.f32.mrb[3].mxu0 }
 0x166   :  { %1468 = vmatmul.mubr.msk.f32.vlgmr.msra.gmra.mrb[2].mxu1 %vm378_vm1, %v2058_v26  ;;  %v1560_v41 = vpack.c.bf16 %v1462_v39, %v369_v40  ;;  %v2088_v56 = vpack.i.bf16 %v1462_v39, %v369_v40 }
 0x168   :  { %1561 = vmatprep.subr.bf16.mxu1 %v1560_v41 }
 0x169   :  { %1563 = vmatpush3.bf16.msra.mxu1 %v1560_v41 }
 0x239   :  { %v1469_v31 = vpop.f32.mrb[2].mxu1 }
 0x23a   :  { %v467_v32 = vmul.f32 %v1469_v31, %v2072_v29  ;;  %v457_v33 = vpop.f32.mrb[3].mxu1 }
 0x23b   :  { %v466_v34 = vmul.f32 %v457_v33, %v2074_v30 }
 0x23c   :  { %vm469_vm5 = vcmp.eq.f32.partialorder %v467_v32, 0.0 }
 0x23d   :  { %vm468_vm4 = vcmp.eq.f32.partialorder %v466_v34, 0.0  ;;  %v471_v37 = vsel %vm469_vm5, -inf, %v467_v32 }
 0x23e   :  { %v470_v35 = vsel %vm468_vm4, -inf, %v466_v34  ;;  %v476_v38 = vsel %vm472_vm3, %v471_v37, -inf }
 0x23f   :  { %v473_v36 = vsel %vm472_vm3, %v470_v35, -inf }
 0x240   :  { %474 = vmax.xlane.f32.xlu0 %v473_v36 }
 0x244   :  { %477 = vmax.xlane.f32.xlu0 %v476_v38 }
 0x25a   :  { %1618 = vrot.lane.b32.xlu0 %v2060_v27, %s1874_s6 }
 0x2cd   :  { %v475_v42 = vpop.xlane.xlu0 %474 }
 0x2ce   :  { %v479_v43 = vsub.f32 %v470_v35, %v475_v42 }
 0x2d0   :  { %v481_v46 = vmul.f32 1.442695, %v479_v43 }
 0x2d1   :  { %v478_v44 = vpop.xlane.xlu0 %477 }
 0x2d2   :  { %v480_v45 = vsub.f32 %v471_v37, %v478_v44 }
 0x2d4   :  { %v483_v47 = vmul.f32 1.442695, %v480_v45 }
 0x2d5   :  { %v1619_v48 = vpop.permute.xlu0 %1618 }
 0x2d6   :  { %1647 = vpow2.f32 %v483_v47  ;;  %v1621_v49 = vunpack.i.h.bf16 %v1619_v48  ;;  %v1620_v50 = vunpack.i.l.bf16 %v1619_v48 }
 0x2d7   :  { %1649 = vpow2.f32 %v481_v46 }
 0x2d8   :  { %v1564_v51 = vpack.c.bf16 %v1621_v49, %v1620_v50 }
 0x2da   :  { %1566 = vmatprep.subr.msk.bf16.mxu1 %vm2054_vm2, %v1564_v51 }
 0x2e0   :  { %v1648_v52 = vpop.eup %1647 }
 0x2e1   :  { %v488_v53 = vsel %vm472_vm3, %v1648_v52, 0.0  ;;  %v1650_v54 = vpop.eup %1649 }
 0x2e2   :  { %489 = vadd.xlane.f32.xlu1 %v488_v53  ;;  %v485_v55 = vsel %vm472_vm3, %v1650_v54, 0.0 }
 0x2e6   :  { %486 = vadd.xlane.f32.xlu1 %v485_v55 }
 0x2f7   :  { %578 = vrot.lane.b32.xlu1 %v2062_v28, %s1874_s6 }
 0x2fb   :  { %580 = vrot.lane.b32.xlu1 %v2058_v26, %s1874_s6 }
 0x36f   :  { %v490_v57 = vpop.xlane.xlu1 %489 }
 0x370   :  { %1651 = vrcp.f32 %v490_v57 }
 0x373   :  { %v487_v58 = vpop.xlane.xlu1 %486 }
 0x374   :  { %1653 = vrcp.f32 %v487_v58 }
 0x377   :  { %v579_v1 = vpop.permute.xlu1 %578 }
 0x37a   :  { %v1652_v59 = vpop.eup %1651 }
 0x37b   :  { %v494_v61 = vmul.f32 %v1652_v59, %v1648_v52  ;;  %v581_v2 = vpop.permute.xlu1 %580 }
 0x37d   :  { %v496_v0 = vmul.f32 %v494_v61, %v2072_v29 }
 0x37e   :  { %v1654_v60 = vpop.eup %1653 }
 0x37f   :  { %v493_v62 = vmul.f32 %v1654_v60, %v1650_v54 }
 0x381   :  { %v495_v63 = vmul.f32 %v493_v62, %v2074_v30 }
 0x383   :  { %1474 = vmatprep.mubr.msk.f32.mxu1 %vm472_vm3, %v495_v63 }
 0x384   :  { %1475 = vmatmul.mubr.msk.f32.vlgmr.msra.gmra.mrb[4].mxu1 %vm472_vm3, %v496_v0 }
 0x385   :  { %1569 = vmatpush3.bf16.xpose.msk.msra.mxu1 %vm2054_vm2, %v1564_v51  ;;  %1481 = vmatprep.mubr.msk.f32.mxu1 %vm378_vm1, %v579_v1 }
 0x38c   :  { %1482 = vmatmul.mubr.msk.f32.vlgmr.msra.gmra.mrb[6].mxu1 %vm378_vm1, %v581_v2 }
 0x457   :  { %v2100_v3 = vpop.f32.mrb[4].mxu1 }
 0x458   :  { %v2102_v4 = vpop.f32.mrb[5].mxu1 }
 0x45f   :  { %v1483_v5 = vpop.f32.mrb[6].mxu1 }
 0x460   :  { %v670_v6 = vmul.f32 %v1483_v5, %v2072_v29  ;;  %v660_v7 = vpop.f32.mrb[7].mxu1 }
 0x461   :  { %v669_v8 = vmul.f32 %v660_v7, %v2074_v30 }
 0x462   :  { %vm672_vm6 = vcmp.eq.f32.partialorder %v670_v6, 0.0 }
 0x463   :  { %v674_v9 = vsel %vm672_vm6, -inf, %v670_v6  ;;  %vm671_vm7 = vcmp.eq.f32.partialorder %v669_v8, 0.0 }
 0x464   :  { %v678_v10 = vsel %vm472_vm3, %v674_v9, -inf  ;;  %v673_v11 = vsel %vm671_vm7, -inf, %v669_v8 }
 0x465   :  { %679 = vmax.xlane.f32.xlu0 %v678_v10  ;;  %v675_v12 = vsel %vm472_vm3, %v673_v11, -inf }
 0x466   :  { %676 = vmax.xlane.f32.xlu1 %v675_v12 }
 0x477   :  { %1623 = vrot.lane.b32.xlu1 %v2088_v56, %s1874_s6 }
 0x47b   :  { %788 = vrot.lane.b32.xlu1 %v2062_v28, %s1875_s16 }
 0x47f   :  { %790 = vrot.lane.b32.xlu1 %v2058_v26, %s1875_s16 }
 0x4f2   :  { %v680_v13 = vpop.xlane.xlu0 %679 }
 0x4f3   :  { %v682_v14 = vsub.f32 %v674_v9, %v680_v13  ;;  %v677_v15 = vpop.xlane.xlu1 %676 }
 0x4f4   :  { %v681_v16 = vsub.f32 %v673_v11, %v677_v15 }
 0x4f5   :  { %v685_v17 = vmul.f32 1.442695, %v682_v14 }
 0x4f6   :  { %v683_v18 = vmul.f32 1.442695, %v681_v16 }
 0x4f7   :  { %1655 = vpow2.f32 %v685_v17  ;;  %v1624_v19 = vpop.permute.xlu1 %1623 }
 0x4f8   :  { %v1626_v20 = vunpack.i.h.bf16 %v1624_v19  ;;  %v1625_v21 = vunpack.i.l.bf16 %v1624_v19  ;;  %1657 = vpow2.f32 %v683_v18 }
 0x4fa   :  { %v1570_v22 = vpack.c.bf16 %v1626_v20, %v1625_v21 }
 0x4fb   :  { %v789_v45 = vpop.permute.xlu1 %788 }
 0x4fc   :  { %1571 = vmatprep.subr.bf16.mxu0 %v1570_v22 }
 0x4fd   :  { %1573 = vmatpush3.bf16.msra.mxu0 %v1570_v22 }
 0x4ff   :  { %v791_v46 = vpop.permute.xlu1 %790 }
 0x501   :  { %v1656_v23 = vpop.eup %1655 }
 0x502   :  { %v690_v25 = vsel %vm472_vm3, %v1656_v23, 0.0  ;;  %v1658_v31 = vpop.eup %1657 }
 0x503   :  { %691 = vadd.xlane.f32.xlu0 %v690_v25  ;;  %v687_v32 = vsel %vm472_vm3, %v1658_v31, 0.0 }
 0x507   :  { %688 = vadd.xlane.f32.xlu0 %v687_v32 }
 0x51d   :  { %1628 = vrot.lane.b32.xlu0 %v2060_v27, %s1875_s16 }
 0x590   :  { %v692_v33 = vpop.xlane.xlu0 %691 }
 0x591   :  { %1659 = vrcp.f32 %v692_v33 }
 0x594   :  { %v689_v34 = vpop.xlane.xlu0 %688 }
 0x595   :  { %1661 = vrcp.f32 %v689_v34 }
 0x598   :  { %v1629_v35 = vpop.permute.xlu0 %1628 }
 0x599   :  { %v1631_v36 = vunpack.i.h.bf16 %v1629_v35  ;;  %v1630_v37 = vunpack.i.l.bf16 %v1629_v35 }
 0x59b   :  { %v1574_v38 = vpack.c.bf16 %v1631_v36, %v1630_v37  ;;  %v1660_v39 = vpop.eup %1659 }
 0x59c   :  { %v696_v41 = vmul.f32 %v1660_v39, %v1656_v23 }
 0x59d   :  { %1576 = vmatprep.subr.msk.bf16.mxu0 %vm2054_vm2, %v1574_v38 }
 0x59e   :  { %v698_v44 = vmul.f32 %v696_v41, %v2072_v29 }
 0x59f   :  { %v1662_v40 = vpop.eup %1661 }
 0x5a0   :  { %v695_v42 = vmul.f32 %v1662_v40, %v1658_v31 }
 0x5a2   :  { %v697_v43 = vmul.f32 %v695_v42, %v2074_v30 }
 0x5a4   :  { %1488 = vmatprep.mubr.msk.f32.mxu0 %vm472_vm3, %v697_v43 }
 0x5a5   :  { %1489 = vmatmul.mubr.msk.f32.vlgmr.msra.gmra.mrb[4].mxu0 %vm472_vm3, %v698_v44 }
 0x5a6   :  { %1579 = vmatpush3.bf16.xpose.msk.msra.mxu0 %vm2054_vm2, %v1574_v38  ;;  %1495 = vmatprep.mubr.msk.f32.mxu0 %vm378_vm1, %v789_v45 }
 0x5ad   :  { %1496 = vmatmul.mubr.msk.f32.vlgmr.msra.gmra.mrb[6].mxu0 %vm378_vm1, %v791_v46 }
 0x678   :  { %v2128_v47 = vpop.f32.mrb[4].mxu0 }
 0x679   :  { %v2130_v48 = vpop.f32.mrb[5].mxu0 }
 0x680   :  { %v1497_v49 = vpop.f32.mrb[6].mxu0 }
 0x681   :  { %v880_v50 = vmul.f32 %v1497_v49, %v2072_v29  ;;  %v870_v51 = vpop.f32.mrb[7].mxu0 }
 0x682   :  { %v879_v52 = vmul.f32 %v870_v51, %v2074_v30 }
 0x683   :  { %vm882_vm8 = vcmp.eq.f32.partialorder %v880_v50, 0.0 }
 0x684   :  { %v884_v53 = vsel %vm882_vm8, -inf, %v880_v50  ;;  %vm881_vm9 = vcmp.eq.f32.partialorder %v879_v52, 0.0 }
 0x685   :  { %v888_v54 = vsel %vm472_vm3, %v884_v53, -inf  ;;  %v883_v55 = vsel %vm881_vm9, -inf, %v879_v52 }
 0x686   :  { %889 = vmax.xlane.f32.xlu0 %v888_v54  ;;  %v885_v57 = vsel %vm472_vm3, %v883_v55, -inf }
 0x687   :  { %886 = vmax.xlane.f32.xlu1 %v885_v57 }
 0x698   :  { %1633 = vrot.lane.b32.xlu1 %v2088_v56, %s1875_s16 }
 0x69c   :  { %996 = vrot.lane.b32.xlu1 %v2062_v28, %s1876_s3 }
 0x6a0   :  { %998 = vrot.lane.b32.xlu1 %v2058_v26, %s1876_s3 }
 0x713   :  { %v890_v58 = vpop.xlane.xlu0 %889 }
 0x714   :  { %v892_v59 = vsub.f32 %v884_v53, %v890_v58  ;;  %v887_v60 = vpop.xlane.xlu1 %886 }
 0x715   :  { %v891_v61 = vsub.f32 %v883_v55, %v887_v60  ;;  %v1236_v60 = vld [vmem:[#allocation13 + $0x8] sm:$0xff] }
 0x716   :  { %v895_v62 = vmul.f32 1.442695, %v892_v59  ;;  %v1235_v59 = vld [vmem:[#allocation13] sm:$0xff] }
 0x717   :  { %v893_v63 = vmul.f32 1.442695, %v891_v61  ;;  %v1237_v61 = vld [vmem:[#allocation13 + $0x10] sm:$0xff] }
 0x718   :  { %1663 = vpow2.f32 %v895_v62  ;;  %v1634_v0 = vpop.permute.xlu1 %1633  ;;  %v1238_v62 = vld [vmem:[#allocation13 + $0x18] sm:$0xff] }
 0x719   :  { %v1636_v1 = vunpack.i.h.bf16 %v1634_v0  ;;  %v1635_v2 = vunpack.i.l.bf16 %v1634_v0  ;;  %1665 = vpow2.f32 %v893_v63  ;;  %v1598_v63 = vpack.c.bf16 %v1238_v62, %v1237_v61 }
 0x71b   :  { %v1580_v5 = vpack.c.bf16 %v1636_v1, %v1635_v2 }
 0x71d   :  { %1581 = vmatprep.subr.bf16.mxu1 %v1580_v5 }
 0x71e   :  { %1583 = vmatpush3.bf16.msra.mxu1 %v1580_v5 }
 0x722   :  { %v1664_v6 = vpop.eup %1663 }
 0x723   :  { %v900_v28 = vsel %vm472_vm3, %v1664_v6, 0.0  ;;  %v1666_v7 = vpop.eup %1665 }
 0x724   :  { %901 = vadd.xlane.f32.xlu0 %v900_v28  ;;  %v897_v26 = vsel %vm472_vm3, %v1666_v7, 0.0 }
 0x728   :  { %898 = vadd.xlane.f32.xlu0 %v897_v26 }
 0x73e   :  { %1638 = vrot.lane.b32.xlu0 %v2060_v27, %s1876_s3  ;;  %v997_v27 = vpop.permute.xlu1 %996 }
 0x742   :  { %v999_v20 = vpop.permute.xlu1 %998 }
 0x7b1   :  { %v902_v8 = vpop.xlane.xlu0 %901 }
 0x7b2   :  { %1667 = vrcp.f32 %v902_v8 }
 0x7b5   :  { %v899_v9 = vpop.xlane.xlu0 %898 }
 0x7b6   :  { %1669 = vrcp.f32 %v899_v9 }
 0x7b9   :  { %v1639_v10 = vpop.permute.xlu0 %1638 }
 0x7ba   :  { %v1641_v11 = vunpack.i.h.bf16 %v1639_v10  ;;  %v1640_v12 = vunpack.i.l.bf16 %v1639_v10 }
 0x7bc   :  { %v1584_v13 = vpack.c.bf16 %v1641_v11, %v1640_v12  ;;  %v1668_v14 = vpop.eup %1667 }
 0x7bd   :  { %v906_v16 = vmul.f32 %v1668_v14, %v1664_v6 }
 0x7be   :  { %1586 = vmatprep.subr.msk.bf16.mxu1 %vm2054_vm2, %v1584_v13 }
 0x7bf   :  { %v908_v19 = vmul.f32 %v906_v16, %v2072_v29 }
 0x7c0   :  { %v1670_v15 = vpop.eup %1669 }
 0x7c1   :  { %v905_v17 = vmul.f32 %v1670_v15, %v1666_v7 }
 0x7c3   :  { %v907_v18 = vmul.f32 %v905_v17, %v2074_v30 }
 0x7c5   :  { %1502 = vmatprep.mubr.msk.f32.mxu1 %vm472_vm3, %v907_v18 }
 0x7c6   :  { %1503 = vmatmul.mubr.msk.f32.vlgmr.msra.gmra.mrb[8].mxu1 %vm472_vm3, %v908_v19 }
 0x7c7   :  { %1589 = vmatpush3.bf16.xpose.msk.msra.mxu1 %vm2054_vm2, %v1584_v13  ;;  %1509 = vmatprep.mubr.msk.f32.mxu1 %vm378_vm1, %v997_v27 }
 0x7ce   :  { %1510 = vmatmul.mubr.msk.f32.vlgmr.msra.gmra.mrb[10].mxu1 %vm378_vm1, %v999_v20 }
 0x899   :  { %v1504_v21 = vpop.f32.mrb[8].mxu1 }
 0x89a   :  { %v987_v22 = vpop.f32.mrb[9].mxu1 }
 0x8a1   :  { %v1511_v23 = vpop.f32.mrb[10].mxu1 }
 0x8a2   :  { %v1088_v25 = vmul.f32 %v1511_v23, %v2072_v29  ;;  %v1078_v31 = vpop.f32.mrb[11].mxu1 }
 0x8a3   :  { %v1087_v32 = vmul.f32 %v1078_v31, %v2074_v30 }
 0x8a4   :  { %vm1090_vm10 = vcmp.eq.f32.partialorder %v1088_v25, 0.0 }
 0x8a5   :  { %v1092_v33 = vsel %vm1090_vm10, -inf, %v1088_v25  ;;  %vm1089_vm11 = vcmp.eq.f32.partialorder %v1087_v32, 0.0 }
 0x8a6   :  { %v1096_v34 = vsel %vm472_vm3, %v1092_v33, -inf  ;;  %v1091_v24 = vsel %vm1089_vm11, -inf, %v1087_v32 }
 0x8a7   :  { %1097 = vmax.xlane.f32.xlu0 %v1096_v34  ;;  %v1093_v35 = vsel %vm472_vm3, %v1091_v24, -inf }
 0x8a8   :  { %1094 = vmax.xlane.f32.xlu1 %v1093_v35 }
 0x8b9   :  { %1643 = vrot.lane.b32.xlu1 %v2088_v56, %s1876_s3 }
 0x8bd   :  { %1208 = vrot.lane.b32.xlu1 %v2128_v47, %s1868_s14 }
 0x8c1   :  { %1214 = vrot.lane.b32.xlu1 %v987_v22, %s1877_s0 }
 0x8c5   :  { %1216 = vrot.lane.b32.xlu1 %v1504_v21, %s1877_s0 }
 0x934   :  { %v1098_v36 = vpop.xlane.xlu0 %1097 }
 0x935   :  { %v1100_v37 = vsub.f32 %v1092_v33, %v1098_v36  ;;  %v1095_v38 = vpop.xlane.xlu1 %1094 }
 0x936   :  { %v1099_v39 = vsub.f32 %v1091_v24, %v1095_v38 }
 0x937   :  { %v1103_v40 = vmul.f32 1.442695, %v1100_v37 }
 0x938   :  { %v1101_v41 = vmul.f32 1.442695, %v1099_v39 }
 0x939   :  { %v1644_v42 = vpop.permute.xlu1 %1643 }
 0x93a   :  { %1671 = vpow2.f32 %v1101_v41  ;;  %v1646_v43 = vunpack.i.h.bf16 %v1644_v42  ;;  %v1645_v44 = vunpack.i.l.bf16 %v1644_v42 }
 0x93b   :  { %1673 = vpow2.f32 %v1103_v40 }
 0x93c   :  { %v1590_v45 = vpack.c.bf16 %v1646_v43, %v1645_v44 }
 0x93d   :  { %v1209_v1 = vpop.permute.xlu1 %1208 }
 0x93e   :  { %1591 = vmatprep.subr.bf16.mxu0 %v1590_v45  ;;  %v1229_v7 = vsel %vm378_vm1, %v2100_v3, %v1209_v1 }
 0x93f   :  { %1593 = vmatpush3.bf16.msra.mxu0 %v1590_v45 }
 0x941   :  { %v1215_v2 = vpop.permute.xlu1 %1214 }
 0x944   :  { %v1672_v56 = vpop.eup %1671 }
 0x945   :  { %v1105_v46 = vsel %vm472_vm3, %v1672_v56, 0.0  ;;  %v1674_v47 = vpop.eup %1673  ;;  %v1217_v5 = vpop.permute.xlu1 %1216 }
 0x946   :  { %1106 = vadd.xlane.f32.xlu0 %v1105_v46  ;;  %v1108_v49 = vsel %vm472_vm3, %v1674_v47, 0.0  ;;  %v1231_v9 = vsel %vm472_vm3, %v1229_v7, %v1217_v5 }
 0x94a   :  { %1109 = vadd.xlane.f32.xlu0 %v1108_v49 }
 0x960   :  { %1206 = vrot.lane.b32.xlu0 %v2130_v48, %s1868_s14  ;;  %v1594_v48 = vpack.c.bf16 %v1236_v60, %v1235_v59 }
 0x962   :  { %1595 = vmatprep.subr.bf16.mxu0 %v1594_v48 }
 0x9d3   :  { %v1107_v50 = vpop.xlane.xlu0 %1106 }
 0x9d4   :  { %1675 = vrcp.f32 %v1107_v50 }
 0x9d7   :  { %v1110_v51 = vpop.xlane.xlu0 %1109 }
 0x9d8   :  { %1677 = vrcp.f32 %v1110_v51 }
 0x9de   :  { %v1676_v52 = vpop.eup %1675 }
 0x9df   :  { %v1113_v53 = vmul.f32 %v1676_v52, %v1672_v56 }
 0x9e1   :  { %v1115_v54 = vmul.f32 %v1113_v53, %v2074_v30 }
 0x9e2   :  { %v1678_v55 = vpop.eup %1677 }
 0x9e3   :  { %v1114_v57 = vmul.f32 %v1678_v55, %v1674_v47  ;;  %1516 = vmatprep.mubr.msk.f32.mxu0 %vm472_vm3, %v1115_v54 }
 0x9e5   :  { %v1116_v58 = vmul.f32 %v1114_v57, %v2072_v29  ;;  %v1207_v29 = vpop.permute.xlu0 %1206 }
 0x9e6   :  { %v1228_v6 = vsel %vm378_vm1, %v2102_v4, %v1207_v29 }
 0x9e7   :  { %1517 = vmatmul.mubr.msk.f32.vlgmr.msra.gmra.mrb[8].mxu0 %vm472_vm3, %v1116_v58  ;;  %v1230_v26 = vsel %vm472_vm3, %v1228_v6, %v1215_v2 }
 0x9e8   :  { %1597 = vmatpush3.bf16.msra.mxu0 %v1594_v48 }
 0x9e9   :  { %1599 = vmatprep.subr.bf16.mxu0 %v1598_v63 }
 0x9ec   :  { %1601 = vmatpush3.bf16.msra.mxu0 %v1598_v63 }
 0xaba   :  { %v1518_v0 = vpop.f32.mrb[8].mxu0 }
 0xabb   :  { %1224 = vrot.lane.b32.xlu1 %v1518_v0, %s1878_s30  ;;  %v1195_v30 = vpop.f32.mrb[9].mxu0 }
 0xabc   :  { %1222 = vrot.lane.b32.xlu0 %v1195_v30, %s1878_s30 }
 0xb2d   :  { %v1225_v28 = vpop.permute.xlu1 %1224 }
 0xb2e   :  { %v1223_v8 = vpop.permute.xlu0 %1222  ;;  %v1234_v11 = vsel %vm1232_vm12, %v1231_v9, %v1225_v28 }
 0xb2f   :  { %v1233_v10 = vsel %vm1232_vm12, %v1230_v26, %v1223_v8 }
 0xb30   :  { %1527 = vmatprep.mubr.msk.f32.mxu0 %vm132_vm0, %v1233_v10 }
 0xb31   :  { %1528 = vmatmul.mubr.msk.f32.vlgmr.msra.gmra.mrb[10].mxu0 %vm132_vm0, %v1234_v11 }
 0xc04   :  { %v1529_v12 = vpop.f32.mrb[10].mxu0 }
 0xc05   :  { %1321 = vst.msk [vmem:[#allocation14 + $0x8] sm:$0xff] %vm132_vm0, %v1529_v12  ;;  %v1311_v4 = vpop.f32.mrb[11].mxu0 }
 0xc06   :  { %1320 = vst.msk [vmem:[#allocation14] sm:$0xff] %vm132_vm0, %v1311_v4 }
 0xc07   :  { %1844 = shalt.err (!%p1841_p4)
}
 0xc08   :  { %s1845_s21 = scalar_lea.hbm %s2204_s7, 256 }
 0xc09   :  { %p1846_p5 = scmp.ne.s32.totalorder %s2204_s7, %s1845_s21  ;;  %p1849_p6 = scmp.lt.u32.totalorder %s1845_s21, %s2204_s7 }
 0xc0b   :  { %p1851_p7 = pnand %p1849_p6, %p1846_p5 }
 0xc0d   :  { %1854 = shalt.err (!%p1851_p7)
}
 0xc0e   :  { %1333 = dma.vmem_to_hbm [thread:$0]  %s1328_s17, 256, %s2204_s7, [#allocation4], %s1867_s13, %s1867_s13, %s1868_s14  }
 0xc0f   :  { %1863 = dma.done.wait [#allocation4], 256  }
 0xc10   :  { %1864 = vsyncadd [#allocation4], 4294967040 }
 0xc11   :  { %1337 = vsyncpa [#allocation3], 1 }
 0xc12   :  { %1338 = vsyncpa [#allocation6], 1 }
 0xc13   :  { %1339 = vsyncpa [#allocation9], 1 }
 0xc14   :  { %1340 = vsyncpa [#allocation12], 1 }
 0xc15   :  { %1341 = vsyncpa [#allocation4], 1 }

</bundles_post_ra>
